<compile_context>
chip_gen: v7x
topology: tpu7x:2x2x1
jax: 0.10.0
libtpu: 0.0.40
codegen_flags: <defaults>
</compile_context>

<pallas_src>
import functools

import jax
import jax.numpy as jnp
from jax import lax
from jax.experimental import pallas as pl
from jax.experimental.pallas import tpu as pltpu

EPS = 1e-5


# ----------------------------------------------------------------------------
# In-kernel helpers
# ----------------------------------------------------------------------------
def _act(x, activation):
    if activation == "relu":
        return jnp.maximum(x, 0.0)
    if activation == "gelu":
        # exact (erf) GELU, matches torch.nn.functional.gelu default
        return 0.5 * x * (1.0 + lax.erf(x / jnp.sqrt(jnp.float32(2.0))))
    raise RuntimeError("Unsupported activation function: {}".format(activation))


# ----------------------------------------------------------------------------
# Fused kernel
# ----------------------------------------------------------------------------
def make_bottleneck_kernel(*, S, W, ksize, inv_cnt_c, inv_cnt_f,
                           activation, mm_dtype, tap_dtype):
    pad = (ksize - 1) // 2

    def gn_act(a, p_ref, g_ref, b_ref, inv_cnt):
        # One-pass GroupNorm + activation on a (rows, S) channels-first tile.
        s = jnp.sum(a, axis=1, keepdims=True)              # (rows, 1)
        sq = jnp.sum(a * a, axis=1, keepdims=True)         # (rows, 1)
        # Spread per-(sample, group) sums back to channels with the
        # block-diagonal same-group matrix P (two tiny matvecs, f32).
        mean = jnp.dot(p_ref[...], s, preferred_element_type=jnp.float32) * inv_cnt
        ex2 = jnp.dot(p_ref[...], sq, preferred_element_type=jnp.float32) * inv_cnt
        var = jnp.maximum(ex2 - mean * mean, 0.0)          # cancellation guard
        scale = g_ref[...] * lax.rsqrt(var + EPS)          # (rows, 1)
        shift = b_ref[...] - mean * scale                  # (rows, 1)
        # Single FMA over the big tensor, then activation (all f32).
        return _act(a * scale + shift, activation)

    def kernel(x_ref,
               pc_ref, gin_ref, bin_ref, win_ref, cbin_ref,
               pf_ref, gff_ref, bff_ref, wff_ref, cbff_ref, mask_ref,
               gout_ref, bout_ref, wout_ref, cbout_ref,
               o_ref):
        def pconv(w_ref, a, cb_ref):
            # 1x1 conv == (block-diagonal) channel matmul; f32 accumulate.
            return jnp.dot(w_ref[...], a.astype(mm_dtype),
                           preferred_element_type=jnp.float32) + cb_ref[...]

        # --- GN(in) -> act -> 1x1 conv -------------------------------------
        a1 = gn_act(x_ref[0], pc_ref, gin_ref, bin_ref, inv_cnt_c)    # (NC, S)
        h1 = pconv(win_ref, a1, cbin_ref)                             # (NF, S)

        # --- GN(ff) -> act -> kxk 'same' conv -------------------------------
        a2 = gn_act(h1, pf_ref, gff_ref, bff_ref, inv_cnt_f)          # (NF, S)
        a2t = a2.astype(tap_dtype)

        # 'same' zero padding folded in: each tap is a lane-rolled copy of a2
        # (XLU slot) times a precomputed in-bounds mask; wrapped lanes are
        # always masked, so no uninitialized memory is ever read.  Accumulated
        # as k*k small matmuls (no materialized im2col buffer).
        h2 = None
        for kh in range(ksize):
            for kw in range(ksize):
                t = kh * ksize + kw
                d = (kh - pad) * W + (kw - pad)
                if kh == pad and kw == pad:
                    tap = a2t                      # centre tap: mask is all ones
                else:
                    tap = (pltpu.roll(a2t, shift=(-d) % S, axis=1)
                           * mask_ref[t:t + 1, :])
                c = jnp.dot(wff_ref[t], tap.astype(mm_dtype),
                            preferred_element_type=jnp.float32)
                h2 = c if h2 is None else h2 + c
        h2 = h2 + cbff_ref[...]                                        # (NF, S)

        # --- GN(out) -> act -> 1x1 conv -> + residual ------------------------
        a3 = gn_act(h2, pf_ref, gout_ref, bout_ref, inv_cnt_f)        # (NF, S)
        # Residual re-read from the resident VMEM block (short live range).
        o_ref[0] = pconv(wout_ref, a3, cbout_ref) + x_ref[0]           # (NC, S)

    return kernel


# ----------------------------------------------------------------------------
# Wrapper
# ----------------------------------------------------------------------------
def _pick_samples_per_block(B, C, F, S, requested):
    if requested is not None:
        assert B % requested == 0
        return requested
    bt = 1
    for cand in range(1, B + 1):
        if B % cand:
            continue
        if cand * C * S * 4 > (2 << 20):        # cap per-step input activations
            continue
        if cand * max(C, F) > 256:              # keep block-diag weights small
            continue
        if B >= 2 and B // cand < 2:            # keep >=2 grid steps (2 TCs on v7x)
            continue
        bt = cand
    return bt


def bottleneck_forward(x_nchw, p, *, num_groups, kernel_size, activation="relu",
                       matmul_dtype=jnp.bfloat16, tap_dtype=None,
                       samples_per_block=None, vmem_limit_bytes=None,
                       interpret=False):
    """Fused Pallas forward of BottleneckLayer.  x_nchw: (B, C, H, W) float32."""
    # TODO(synk): even kernel sizes need asymmetric 'same' padding (not handled).
    assert kernel_size % 2 == 1
    B, C, H, W = x_nchw.shape
    S = H * W
    F = p["in_conv_w"].shape[0]
    G = num_groups
    assert C % G == 0 and F % G == 0
    k = kernel_size
    pad = (k - 1) // 2
    f32 = jnp.float32
    if tap_dtype is None:
        # f32 keeps the roll/mask tap math on the universally supported path;
        # on v6e/v7x pass tap_dtype=jnp.bfloat16 to halve the per-tap VPU work
        # (keep f32 on v5e, which has no bf16 VPU).
        tap_dtype = f32

    # Stack Bt samples per grid step on the sublane axis (channels-first,
    # H*W on the 128-lane axis): amortizes per-step pipeline overhead and
    # fills the 8 f32 sublanes even at tiny channel counts.
    Bt = _pick_samples_per_block(B, C, F, S, samples_per_block)
    NB = B // Bt
    NC, NF = Bt * C, Bt * F

    x = x_nchw.reshape(NB, NC, S).astype(f32)

    eye_bt = jnp.eye(Bt, dtype=f32)

    def group_mat(Cn):                        # (Cn, Cn) same-group 0/1, per sample
        g = jnp.arange(Cn) // (Cn // G)
        return (g[:, None] == g[None, :]).astype(f32)

    def bdiag(m):                             # per-sample matrix -> block-diagonal
        return jnp.kron(eye_bt, m.astype(f32))

    def col(v):                               # per-channel vector -> (Bt*Cn, 1)
        return jnp.tile(jnp.asarray(v, f32).reshape(-1, 1), (Bt, 1))

    Pc, Pf = bdiag(group_mat(C)), bdiag(group_mat(F))
    gin, bin_ = col(p["in_norm_w"]), col(p["in_norm_b"])
    gff, bff = col(p["ff_norm_w"]), col(p["ff_norm_b"])
    gout, bout = col(p["out_norm_w"]), col(p["out_norm_b"])
    cb_in, cb_ff, cb_out = col(p["in_conv_b"]), col(p["ff_conv_b"]), col(p["out_conv_b"])

    # Conv weights: block-diagonal across stacked samples, MXU operand dtype
    # (bf16 by default -> halves weight DMA, f32 accumulation in-kernel).
    w_in = bdiag(p["in_conv_w"].reshape(F, C)).astype(matmul_dtype)      # (NF, NC)
    w_out = bdiag(p["out_conv_w"].reshape(C, F)).astype(matmul_dtype)    # (NC, NF)
    w_ff_taps = jnp.stack(
        [bdiag(p["ff_conv_w"][:, :, kh, kw]) for kh in range(k) for kw in range(k)],
        axis=0).astype(matmul_dtype)                                     # (k*k, NF, NF)

    # Per-tap validity masks ('same' zero padding folded in): zero every output
    # position whose source pixel (y+dy, x+dx) lies outside the HxW image.
    pos = jnp.arange(S)
    yy, xx = pos // W, pos % W
    rows = []
    for kh in range(k):
        for kw in range(k):
            dy, dx = kh - pad, kw - pad
            rows.append(((yy + dy >= 0) & (yy + dy < H) &
                         (xx + dx >= 0) & (xx + dx < W)))
    mask = jnp.stack(rows, axis=0).astype(tap_dtype)                     # (k*k, S)

    kernel = make_bottleneck_kernel(
        S=S, W=W, ksize=k,
        inv_cnt_c=1.0 / float(S * (C // G)),
        inv_cnt_f=1.0 / float(S * (F // G)),
        activation=activation, mm_dtype=matmul_dtype, tap_dtype=tap_dtype)

    # Whole-array parameter blocks with constant index maps: fetched once and
    # kept resident across grid steps.
    def const_spec(a):
        return pl.BlockSpec(tuple(a.shape), lambda *_: (0,) * a.ndim)

    params_list = [Pc, gin, bin_, w_in, cb_in,
                   Pf, gff, bff, w_ff_taps, cb_ff, mask,
                   gout, bout, w_out, cb_out]

    if vmem_limit_bytes is None:
        blk = NC * S * 4
        act = max(NC, NF) * S * 4
        param_bytes = sum(int(a.size) * a.dtype.itemsize for a in params_list)
        est = 4 * blk + 12 * act + 2 * param_bytes + (4 << 20)
        vmem_limit_bytes = int(min(max(est, 16 << 20), 48 << 20))  # v7x-safe cap

    out = pl.pallas_call(
        kernel,
        out_shape=jax.ShapeDtypeStruct((NB, NC, S), f32),
        grid=(NB,),                                   # one sample-block per step
        in_specs=[pl.BlockSpec((1, NC, S), lambda b: (b, 0, 0))] +
                 [const_spec(a) for a in params_list],
        out_specs=pl.BlockSpec((1, NC, S), lambda b: (b, 0, 0)),
        compiler_params=pltpu.CompilerParams(
            dimension_semantics=("parallel",),        # megacore sharding on v7x
            vmem_limit_bytes=vmem_limit_bytes),
        interpret=interpret,
    )(x, *params_list)

    # TODO(synk): for large H*W on v7x, add a second (spatial) grid axis with
    # row-aligned tiles, a two-pass GroupNorm and pad-row halo DMA.
    return out.reshape(B, C, H, W)


# ----------------------------------------------------------------------------
# Parameters (deterministic synthetic init, PyTorch OIHW conventions)
# ----------------------------------------------------------------------------
def init_params(key, dim, ff_dim, kernel_size):
    ks = jax.random.split(key, 12)
    return {
        "in_conv_w":  0.2 * jax.random.normal(ks[0], (ff_dim, dim, 1, 1), jnp.float32),
        "in_conv_b":  0.1 * jax.random.normal(ks[1], (ff_dim,), jnp.float32),
        "ff_conv_w":  0.1 * jax.random.normal(ks[2], (ff_dim, ff_dim, kernel_size, kernel_size), jnp.float32),
        "ff_conv_b":  0.1 * jax.random.normal(ks[3], (ff_dim,), jnp.float32),
        "out_conv_w": 0.2 * jax.random.normal(ks[4], (dim, ff_dim, 1, 1), jnp.float32),
        "out_conv_b": 0.1 * jax.random.normal(ks[5], (dim,), jnp.float32),
        "in_norm_w":  1.0 + 0.1 * jax.random.normal(ks[6], (dim,), jnp.float32),
        "in_norm_b":  0.1 * jax.random.normal(ks[7], (dim,), jnp.float32),
        "ff_norm_w":  1.0 + 0.1 * jax.random.normal(ks[8], (ff_dim,), jnp.float32),
        "ff_norm_b":  0.1 * jax.random.normal(ks[9], (ff_dim,), jnp.float32),
        "out_norm_w": 1.0 + 0.1 * jax.random.normal(ks[10], (ff_dim,), jnp.float32),
        "out_norm_b": 0.1 * jax.random.normal(ks[11], (ff_dim,), jnp.float32),
    }


# ----------------------------------------------------------------------------
# Pure-JAX reference (matches the PyTorch module semantics)
# ----------------------------------------------------------------------------
def reference_forward(x, p, *, num_groups, kernel_size, activation="relu"):
    def gn(x, w, b, G):
        B, C, H, W = x.shape
        xg = x.reshape(B, G, C // G, H * W)
        m = xg.mean(axis=(2, 3), keepdims=True)
        v = ((xg - m) ** 2).mean(axis=(2, 3), keepdims=True)
        xn = ((xg - m) / jnp.sqrt(v + EPS)).reshape(B, C, H, W)
        return xn * w[None, :, None, None] + b[None, :, None, None]

    def act(x):
        return jnp.maximum(x, 0.0) if activation == "relu" else jax.nn.gelu(x, approximate=False)

    def conv(x, w, b):
        y = lax.conv_general_dilated(x, w, (1, 1), "SAME",
                                     dimension_numbers=("NCHW", "OIHW", "NCHW"))
        return y + b[None, :, None, None]

    residual = x
    h = conv(act(gn(x, p["in_norm_w"], p["in_norm_b"], num_groups)),
             p["in_conv_w"], p["in_conv_b"])
    h = conv(act(gn(h, p["ff_norm_w"], p["ff_norm_b"], num_groups)),
             p["ff_conv_w"], p["ff_conv_b"])
    h = conv(act(gn(h, p["out_norm_w"], p["out_norm_b"], num_groups)),
             p["out_conv_w"], p["out_conv_b"])
    return residual + h


# ----------------------------------------------------------------------------
if __name__ == "__main__":
    dim, ff_dim, kernel_size, num_groups = 4, 8, 3, 2
    B, H, W = 2, 16, 16
    activation = "relu"

    key = jax.random.PRNGKey(0)
    kx, kp = jax.random.split(key)
    x = jax.random.normal(kx, (B, dim, H, W), jnp.float32)
    params = init_params(kp, dim, ff_dim, kernel_size)

    ref = reference_forward(x, params, num_groups=num_groups,
                            kernel_size=kernel_size, activation=activation)

    fwd = functools.partial(bottleneck_forward, num_groups=num_groups,
                            kernel_size=kernel_size, activation=activation)

    # f32 MXU operands: tight check against the pure-JAX reference.
    out_f32 = jax.block_until_ready(
        jax.jit(functools.partial(fwd, matmul_dtype=jnp.float32))(x, params))
    assert out_f32.shape == ref.shape == (B, dim, H, W)
    err_f32 = float(jnp.max(jnp.abs(out_f32 - ref)))
    assert jnp.allclose(out_f32, ref, atol=1e-3, rtol=1e-3), err_f32

    # Sublane-stacked path (2 samples per grid step, block-diagonal weights).
    out_stacked = jax.block_until_ready(
        jax.jit(functools.partial(fwd, matmul_dtype=jnp.float32,
                                  samples_per_block=2))(x, params))
    err_st = float(jnp.max(jnp.abs(out_stacked - ref)))
    assert jnp.allclose(out_stacked, ref, atol=1e-3, rtol=1e-3), err_st

    # Default path: bf16 MXU operands with f32 accumulation; looser check.
    out_bf16 = jax.block_until_ready(jax.jit(fwd)(x, params))
    err_bf16 = float(jnp.max(jnp.abs(out_bf16 - ref)))
    assert jnp.allclose(out_bf16, ref, atol=8e-2, rtol=8e-2), err_bf16

    print("KERNEL_OK")
</pallas_src>

<mosaic_0001>
module attributes {stable_mosaic.version = 11 : i64} {
  func.func @kernel(%arg0: i32, %arg1: memref<1x4x256xf32, #tpu.memory_space<vmem>>, %arg2: memref<4x4xf32, #tpu.memory_space<vmem>>, %arg3: memref<4x1xf32, #tpu.memory_space<vmem>>, %arg4: memref<4x1xf32, #tpu.memory_space<vmem>>, %arg5: memref<8x4xf32, #tpu.memory_space<vmem>>, %arg6: memref<8x1xf32, #tpu.memory_space<vmem>>, %arg7: memref<8x8xf32, #tpu.memory_space<vmem>>, %arg8: memref<8x1xf32, #tpu.memory_space<vmem>>, %arg9: memref<8x1xf32, #tpu.memory_space<vmem>>, %arg10: memref<9x8x8xf32, #tpu.memory_space<vmem>>, %arg11: memref<8x1xf32, #tpu.memory_space<vmem>>, %arg12: memref<9x256xf32, #tpu.memory_space<vmem>>, %arg13: memref<8x1xf32, #tpu.memory_space<vmem>>, %arg14: memref<8x1xf32, #tpu.memory_space<vmem>>, %arg15: memref<4x8xf32, #tpu.memory_space<vmem>>, %arg16: memref<4x1xf32, #tpu.memory_space<vmem>>, %arg17: memref<1x4x256xf32, #tpu.memory_space<vmem>>) attributes {dimension_semantics = [#tpu.dimension_semantics<parallel>], iteration_bounds = array<i64: 2>, scalar_prefetch = 0 : i64, scratch_operands = 0 : i64, tpu.core_type = #tpu.core_type<tc>, window_params = [{transform_indices = @transform_0, window_bounds = array<i64: 1, 4, 256>}, {pipeline_mode = #tpu.pipeline_mode<synchronous>, transform_indices = @transform_1, window_bounds = array<i64: 4, 4>}, {pipeline_mode = #tpu.pipeline_mode<synchronous>, transform_indices = @transform_2, window_bounds = array<i64: 4, 1>}, {pipeline_mode = #tpu.pipeline_mode<synchronous>, transform_indices = @transform_3, window_bounds = array<i64: 4, 1>}, {pipeline_mode = #tpu.pipeline_mode<synchronous>, transform_indices = @transform_4, window_bounds = array<i64: 8, 4>}, {pipeline_mode = #tpu.pipeline_mode<synchronous>, transform_indices = @transform_5, window_bounds = array<i64: 8, 1>}, {pipeline_mode = #tpu.pipeline_mode<synchronous>, transform_indices = @transform_6, window_bounds = array<i64: 8, 8>}, {pipeline_mode = #tpu.pipeline_mode<synchronous>, transform_indices = @transform_7, window_bounds = array<i64: 8, 1>}, {pipeline_mode = #tpu.pipeline_mode<synchronous>, transform_indices = @transform_8, window_bounds = array<i64: 8, 1>}, {pipeline_mode = #tpu.pipeline_mode<synchronous>, transform_indices = @transform_9, window_bounds = array<i64: 9, 8, 8>}, {pipeline_mode = #tpu.pipeline_mode<synchronous>, transform_indices = @transform_10, window_bounds = array<i64: 8, 1>}, {pipeline_mode = #tpu.pipeline_mode<synchronous>, transform_indices = @transform_11, window_bounds = array<i64: 9, 256>}, {pipeline_mode = #tpu.pipeline_mode<synchronous>, transform_indices = @transform_12, window_bounds = array<i64: 8, 1>}, {pipeline_mode = #tpu.pipeline_mode<synchronous>, transform_indices = @transform_13, window_bounds = array<i64: 8, 1>}, {pipeline_mode = #tpu.pipeline_mode<synchronous>, transform_indices = @transform_14, window_bounds = array<i64: 4, 8>}, {pipeline_mode = #tpu.pipeline_mode<synchronous>, transform_indices = @transform_15, window_bounds = array<i64: 4, 1>}, {transform_indices = @transform_16, window_bounds = array<i64: 1, 4, 256>}]} {
    %c0 = arith.constant 0 : index
    %c0_0 = arith.constant 0 : index
    %c0_1 = arith.constant 0 : index
    %0 = vector.load %arg1[%c0, %c0_0, %c0_1] : memref<1x4x256xf32, #tpu.memory_space<vmem>>, vector<1x4x256xf32>
    %1 = vector.shape_cast %0 : vector<1x4x256xf32> to vector<4x256xf32>
    %cst = arith.constant dense<0.000000e+00> : vector<4xf32>
    %2 = vector.multi_reduction <add>, %1, %cst [1] : vector<4x256xf32> to vector<4xf32>
    %3 = vector.shape_cast %2 : vector<4xf32> to vector<4x1xf32>
    %4 = arith.mulf %1, %1 : vector<4x256xf32>
    %cst_2 = arith.constant dense<0.000000e+00> : vector<4xf32>
    %5 = vector.multi_reduction <add>, %4, %cst_2 [1] : vector<4x256xf32> to vector<4xf32>
    %6 = vector.shape_cast %5 : vector<4xf32> to vector<4x1xf32>
    %c0_3 = arith.constant 0 : index
    %c0_4 = arith.constant 0 : index
    %7 = vector.load %arg2[%c0_3, %c0_4] : memref<4x4xf32, #tpu.memory_space<vmem>>, vector<4x4xf32>
    %cst_5 = arith.constant dense<0.000000e+00> : vector<4x1xf32>
    %8 = tpu.matmul %7, %3, %cst_5 {dimension_numbers = #tpu.dot_dimension_numbers<[1], [0], [0], [1], [0, 0, 1, 1], [], []>} : vector<4x4xf32>, vector<4x1xf32>, vector<4x1xf32> -> vector<4x1xf32>
    %cst_6 = arith.constant 0.001953125 : f32
    %9 = vector.broadcast %cst_6 : f32 to vector<4x1xf32>
    %10 = arith.mulf %8, %9 : vector<4x1xf32>
    %c0_7 = arith.constant 0 : index
    %c0_8 = arith.constant 0 : index
    %11 = vector.load %arg2[%c0_7, %c0_8] : memref<4x4xf32, #tpu.memory_space<vmem>>, vector<4x4xf32>
    %cst_9 = arith.constant dense<0.000000e+00> : vector<4x1xf32>
    %12 = tpu.matmul %11, %6, %cst_9 {dimension_numbers = #tpu.dot_dimension_numbers<[1], [0], [0], [1], [0, 0, 1, 1], [], []>} : vector<4x4xf32>, vector<4x1xf32>, vector<4x1xf32> -> vector<4x1xf32>
    %cst_10 = arith.constant 0.001953125 : f32
    %13 = vector.broadcast %cst_10 : f32 to vector<4x1xf32>
    %14 = arith.mulf %12, %13 : vector<4x1xf32>
    %15 = arith.mulf %10, %10 : vector<4x1xf32>
    %16 = arith.subf %14, %15 : vector<4x1xf32>
    %cst_11 = arith.constant 0.000000e+00 : f32
    %17 = vector.broadcast %cst_11 : f32 to vector<4x1xf32>
    %18 = arith.maximumf %16, %17 : vector<4x1xf32>
    %c0_12 = arith.constant 0 : index
    %c0_13 = arith.constant 0 : index
    %19 = vector.load %arg3[%c0_12, %c0_13] : memref<4x1xf32, #tpu.memory_space<vmem>>, vector<4x1xf32>
    %cst_14 = arith.constant 9.99999974E-6 : f32
    %20 = vector.broadcast %cst_14 : f32 to vector<4x1xf32>
    %21 = arith.addf %18, %20 : vector<4x1xf32>
    %22 = math.rsqrt %21 : vector<4x1xf32>
    %23 = arith.mulf %19, %22 : vector<4x1xf32>
    %c0_15 = arith.constant 0 : index
    %c0_16 = arith.constant 0 : index
    %24 = vector.load %arg4[%c0_15, %c0_16] : memref<4x1xf32, #tpu.memory_space<vmem>>, vector<4x1xf32>
    %25 = arith.mulf %10, %23 : vector<4x1xf32>
    %26 = arith.subf %24, %25 : vector<4x1xf32>
    %27 = vector.broadcast %23 : vector<4x1xf32> to vector<4x256xf32>
    %28 = arith.mulf %1, %27 : vector<4x256xf32>
    %29 = vector.broadcast %26 : vector<4x1xf32> to vector<4x256xf32>
    %30 = arith.addf %28, %29 : vector<4x256xf32>
    %cst_17 = arith.constant 0.000000e+00 : f32
    %31 = vector.broadcast %cst_17 : f32 to vector<4x256xf32>
    %32 = arith.maximumf %30, %31 : vector<4x256xf32>
    %c0_18 = arith.constant 0 : index
    %c0_19 = arith.constant 0 : index
    %33 = vector.load %arg5[%c0_18, %c0_19] : memref<8x4xf32, #tpu.memory_space<vmem>>, vector<8x4xf32>
    %cst_20 = arith.constant dense<0.000000e+00> : vector<8x256xf32>
    %34 = tpu.matmul %33, %32, %cst_20 {dimension_numbers = #tpu.dot_dimension_numbers<[1], [0], [0], [1], [0, 0, 1, 1], [], []>} : vector<8x4xf32>, vector<4x256xf32>, vector<8x256xf32> -> vector<8x256xf32>
    %c0_21 = arith.constant 0 : index
    %c0_22 = arith.constant 0 : index
    %35 = vector.load %arg6[%c0_21, %c0_22] : memref<8x1xf32, #tpu.memory_space<vmem>>, vector<8x1xf32>
    %36 = vector.broadcast %35 : vector<8x1xf32> to vector<8x256xf32>
    %37 = arith.addf %34, %36 : vector<8x256xf32>
    %cst_23 = arith.constant dense<0.000000e+00> : vector<8xf32>
    %38 = vector.multi_reduction <add>, %37, %cst_23 [1] : vector<8x256xf32> to vector<8xf32>
    %39 = vector.shape_cast %38 : vector<8xf32> to vector<8x1xf32>
    %40 = arith.mulf %37, %37 : vector<8x256xf32>
    %cst_24 = arith.constant dense<0.000000e+00> : vector<8xf32>
    %41 = vector.multi_reduction <add>, %40, %cst_24 [1] : vector<8x256xf32> to vector<8xf32>
    %42 = vector.shape_cast %41 : vector<8xf32> to vector<8x1xf32>
    %c0_25 = arith.constant 0 : index
    %c0_26 = arith.constant 0 : index
    %43 = vector.load %arg7[%c0_25, %c0_26] : memref<8x8xf32, #tpu.memory_space<vmem>>, vector<8x8xf32>
    %cst_27 = arith.constant dense<0.000000e+00> : vector<8x1xf32>
    %44 = tpu.matmul %43, %39, %cst_27 {dimension_numbers = #tpu.dot_dimension_numbers<[1], [0], [0], [1], [0, 0, 1, 1], [], []>} : vector<8x8xf32>, vector<8x1xf32>, vector<8x1xf32> -> vector<8x1xf32>
    %cst_28 = arith.constant 9.765625E-4 : f32
    %45 = vector.broadcast %cst_28 : f32 to vector<8x1xf32>
    %46 = arith.mulf %44, %45 : vector<8x1xf32>
    %c0_29 = arith.constant 0 : index
    %c0_30 = arith.constant 0 : index
    %47 = vector.load %arg7[%c0_29, %c0_30] : memref<8x8xf32, #tpu.memory_space<vmem>>, vector<8x8xf32>
    %cst_31 = arith.constant dense<0.000000e+00> : vector<8x1xf32>
    %48 = tpu.matmul %47, %42, %cst_31 {dimension_numbers = #tpu.dot_dimension_numbers<[1], [0], [0], [1], [0, 0, 1, 1], [], []>} : vector<8x8xf32>, vector<8x1xf32>, vector<8x1xf32> -> vector<8x1xf32>
    %cst_32 = arith.constant 9.765625E-4 : f32
    %49 = vector.broadcast %cst_32 : f32 to vector<8x1xf32>
    %50 = arith.mulf %48, %49 : vector<8x1xf32>
    %51 = arith.mulf %46, %46 : vector<8x1xf32>
    %52 = arith.subf %50, %51 : vector<8x1xf32>
    %cst_33 = arith.constant 0.000000e+00 : f32
    %53 = vector.broadcast %cst_33 : f32 to vector<8x1xf32>
    %54 = arith.maximumf %52, %53 : vector<8x1xf32>
    %c0_34 = arith.constant 0 : index
    %c0_35 = arith.constant 0 : index
    %55 = vector.load %arg8[%c0_34, %c0_35] : memref<8x1xf32, #tpu.memory_space<vmem>>, vector<8x1xf32>
    %cst_36 = arith.constant 9.99999974E-6 : f32
    %56 = vector.broadcast %cst_36 : f32 to vector<8x1xf32>
    %57 = arith.addf %54, %56 : vector<8x1xf32>
    %58 = math.rsqrt %57 : vector<8x1xf32>
    %59 = arith.mulf %55, %58 : vector<8x1xf32>
    %c0_37 = arith.constant 0 : index
    %c0_38 = arith.constant 0 : index
    %60 = vector.load %arg9[%c0_37, %c0_38] : memref<8x1xf32, #tpu.memory_space<vmem>>, vector<8x1xf32>
    %61 = arith.mulf %46, %59 : vector<8x1xf32>
    %62 = arith.subf %60, %61 : vector<8x1xf32>
    %63 = vector.broadcast %59 : vector<8x1xf32> to vector<8x256xf32>
    %64 = arith.mulf %37, %63 : vector<8x256xf32>
    %65 = vector.broadcast %62 : vector<8x1xf32> to vector<8x256xf32>
    %66 = arith.addf %64, %65 : vector<8x256xf32>
    %cst_39 = arith.constant 0.000000e+00 : f32
    %67 = vector.broadcast %cst_39 : f32 to vector<8x256xf32>
    %68 = arith.maximumf %66, %67 : vector<8x256xf32>
    %c17_i32 = arith.constant 17 : i32
    %69 = tpu.dynamic_rotate %68 by %c17_i32 dim 1 : vector<8x256xf32>, i32 -> vector<8x256xf32>
    %c0_40 = arith.constant 0 : index
    %c0_41 = arith.constant 0 : index
    %70 = vector.load %arg12[%c0_40, %c0_41] : memref<9x256xf32, #tpu.memory_space<vmem>>, vector<1x256xf32>
    %71 = vector.broadcast %70 : vector<1x256xf32> to vector<8x256xf32>
    %72 = arith.mulf %69, %71 : vector<8x256xf32>
    %c0_42 = arith.constant 0 : index
    %c0_43 = arith.constant 0 : index
    %c0_44 = arith.constant 0 : index
    %73 = vector.load %arg10[%c0_42, %c0_43, %c0_44] : memref<9x8x8xf32, #tpu.memory_space<vmem>>, vector<1x8x8xf32>
    %74 = vector.shape_cast %73 : vector<1x8x8xf32> to vector<8x8xf32>
    %cst_45 = arith.constant dense<0.000000e+00> : vector<8x256xf32>
    %75 = tpu.matmul %74, %72, %cst_45 {dimension_numbers = #tpu.dot_dimension_numbers<[1], [0], [0], [1], [0, 0, 1, 1], [], []>} : vector<8x8xf32>, vector<8x256xf32>, vector<8x256xf32> -> vector<8x256xf32>
    %c16_i32 = arith.constant 16 : i32
    %76 = tpu.dynamic_rotate %68 by %c16_i32 dim 1 : vector<8x256xf32>, i32 -> vector<8x256xf32>
    %c1 = arith.constant 1 : index
    %c0_46 = arith.constant 0 : index
    %77 = vector.load %arg12[%c1, %c0_46] : memref<9x256xf32, #tpu.memory_space<vmem>>, vector<1x256xf32>
    %78 = vector.broadcast %77 : vector<1x256xf32> to vector<8x256xf32>
    %79 = arith.mulf %76, %78 : vector<8x256xf32>
    %c1_47 = arith.constant 1 : index
    %c0_48 = arith.constant 0 : index
    %c0_49 = arith.constant 0 : index
    %80 = vector.load %arg10[%c1_47, %c0_48, %c0_49] : memref<9x8x8xf32, #tpu.memory_space<vmem>>, vector<1x8x8xf32>
    %81 = vector.shape_cast %80 : vector<1x8x8xf32> to vector<8x8xf32>
    %cst_50 = arith.constant dense<0.000000e+00> : vector<8x256xf32>
    %82 = tpu.matmul %81, %79, %cst_50 {dimension_numbers = #tpu.dot_dimension_numbers<[1], [0], [0], [1], [0, 0, 1, 1], [], []>} : vector<8x8xf32>, vector<8x256xf32>, vector<8x256xf32> -> vector<8x256xf32>
    %83 = arith.addf %75, %82 : vector<8x256xf32>
    %c15_i32 = arith.constant 15 : i32
    %84 = tpu.dynamic_rotate %68 by %c15_i32 dim 1 : vector<8x256xf32>, i32 -> vector<8x256xf32>
    %c2 = arith.constant 2 : index
    %c0_51 = arith.constant 0 : index
    %85 = vector.load %arg12[%c2, %c0_51] : memref<9x256xf32, #tpu.memory_space<vmem>>, vector<1x256xf32>
    %86 = vector.broadcast %85 : vector<1x256xf32> to vector<8x256xf32>
    %87 = arith.mulf %84, %86 : vector<8x256xf32>
    %c2_52 = arith.constant 2 : index
    %c0_53 = arith.constant 0 : index
    %c0_54 = arith.constant 0 : index
    %88 = vector.load %arg10[%c2_52, %c0_53, %c0_54] : memref<9x8x8xf32, #tpu.memory_space<vmem>>, vector<1x8x8xf32>
    %89 = vector.shape_cast %88 : vector<1x8x8xf32> to vector<8x8xf32>
    %cst_55 = arith.constant dense<0.000000e+00> : vector<8x256xf32>
    %90 = tpu.matmul %89, %87, %cst_55 {dimension_numbers = #tpu.dot_dimension_numbers<[1], [0], [0], [1], [0, 0, 1, 1], [], []>} : vector<8x8xf32>, vector<8x256xf32>, vector<8x256xf32> -> vector<8x256xf32>
    %91 = arith.addf %83, %90 : vector<8x256xf32>
    %c1_i32 = arith.constant 1 : i32
    %92 = tpu.dynamic_rotate %68 by %c1_i32 dim 1 : vector<8x256xf32>, i32 -> vector<8x256xf32>
    %c3 = arith.constant 3 : index
    %c0_56 = arith.constant 0 : index
    %93 = vector.load %arg12[%c3, %c0_56] : memref<9x256xf32, #tpu.memory_space<vmem>>, vector<1x256xf32>
    %94 = vector.broadcast %93 : vector<1x256xf32> to vector<8x256xf32>
    %95 = arith.mulf %92, %94 : vector<8x256xf32>
    %c3_57 = arith.constant 3 : index
    %c0_58 = arith.constant 0 : index
    %c0_59 = arith.constant 0 : index
    %96 = vector.load %arg10[%c3_57, %c0_58, %c0_59] : memref<9x8x8xf32, #tpu.memory_space<vmem>>, vector<1x8x8xf32>
    %97 = vector.shape_cast %96 : vector<1x8x8xf32> to vector<8x8xf32>
    %cst_60 = arith.constant dense<0.000000e+00> : vector<8x256xf32>
    %98 = tpu.matmul %97, %95, %cst_60 {dimension_numbers = #tpu.dot_dimension_numbers<[1], [0], [0], [1], [0, 0, 1, 1], [], []>} : vector<8x8xf32>, vector<8x256xf32>, vector<8x256xf32> -> vector<8x256xf32>
    %99 = arith.addf %91, %98 : vector<8x256xf32>
    %c4 = arith.constant 4 : index
    %c0_61 = arith.constant 0 : index
    %c0_62 = arith.constant 0 : index
    %100 = vector.load %arg10[%c4, %c0_61, %c0_62] : memref<9x8x8xf32, #tpu.memory_space<vmem>>, vector<1x8x8xf32>
    %101 = vector.shape_cast %100 : vector<1x8x8xf32> to vector<8x8xf32>
    %cst_63 = arith.constant dense<0.000000e+00> : vector<8x256xf32>
    %102 = tpu.matmul %101, %68, %cst_63 {dimension_numbers = #tpu.dot_dimension_numbers<[1], [0], [0], [1], [0, 0, 1, 1], [], []>} : vector<8x8xf32>, vector<8x256xf32>, vector<8x256xf32> -> vector<8x256xf32>
    %103 = arith.addf %99, %102 : vector<8x256xf32>
    %c255_i32 = arith.constant 255 : i32
    %104 = tpu.dynamic_rotate %68 by %c255_i32 dim 1 : vector<8x256xf32>, i32 -> vector<8x256xf32>
    %c5 = arith.constant 5 : index
    %c0_64 = arith.constant 0 : index
    %105 = vector.load %arg12[%c5, %c0_64] : memref<9x256xf32, #tpu.memory_space<vmem>>, vector<1x256xf32>
    %106 = vector.broadcast %105 : vector<1x256xf32> to vector<8x256xf32>
    %107 = arith.mulf %104, %106 : vector<8x256xf32>
    %c5_65 = arith.constant 5 : index
    %c0_66 = arith.constant 0 : index
    %c0_67 = arith.constant 0 : index
    %108 = vector.load %arg10[%c5_65, %c0_66, %c0_67] : memref<9x8x8xf32, #tpu.memory_space<vmem>>, vector<1x8x8xf32>
    %109 = vector.shape_cast %108 : vector<1x8x8xf32> to vector<8x8xf32>
    %cst_68 = arith.constant dense<0.000000e+00> : vector<8x256xf32>
    %110 = tpu.matmul %109, %107, %cst_68 {dimension_numbers = #tpu.dot_dimension_numbers<[1], [0], [0], [1], [0, 0, 1, 1], [], []>} : vector<8x8xf32>, vector<8x256xf32>, vector<8x256xf32> -> vector<8x256xf32>
    %111 = arith.addf %103, %110 : vector<8x256xf32>
    %c241_i32 = arith.constant 241 : i32
    %112 = tpu.dynamic_rotate %68 by %c241_i32 dim 1 : vector<8x256xf32>, i32 -> vector<8x256xf32>
    %c6 = arith.constant 6 : index
    %c0_69 = arith.constant 0 : index
    %113 = vector.load %arg12[%c6, %c0_69] : memref<9x256xf32, #tpu.memory_space<vmem>>, vector<1x256xf32>
    %114 = vector.broadcast %113 : vector<1x256xf32> to vector<8x256xf32>
    %115 = arith.mulf %112, %114 : vector<8x256xf32>
    %c6_70 = arith.constant 6 : index
    %c0_71 = arith.constant 0 : index
    %c0_72 = arith.constant 0 : index
    %116 = vector.load %arg10[%c6_70, %c0_71, %c0_72] : memref<9x8x8xf32, #tpu.memory_space<vmem>>, vector<1x8x8xf32>
    %117 = vector.shape_cast %116 : vector<1x8x8xf32> to vector<8x8xf32>
    %cst_73 = arith.constant dense<0.000000e+00> : vector<8x256xf32>
    %118 = tpu.matmul %117, %115, %cst_73 {dimension_numbers = #tpu.dot_dimension_numbers<[1], [0], [0], [1], [0, 0, 1, 1], [], []>} : vector<8x8xf32>, vector<8x256xf32>, vector<8x256xf32> -> vector<8x256xf32>
    %119 = arith.addf %111, %118 : vector<8x256xf32>
    %c240_i32 = arith.constant 240 : i32
    %120 = tpu.dynamic_rotate %68 by %c240_i32 dim 1 : vector<8x256xf32>, i32 -> vector<8x256xf32>
    %c7 = arith.constant 7 : index
    %c0_74 = arith.constant 0 : index
    %121 = vector.load %arg12[%c7, %c0_74] : memref<9x256xf32, #tpu.memory_space<vmem>>, vector<1x256xf32>
    %122 = vector.broadcast %121 : vector<1x256xf32> to vector<8x256xf32>
    %123 = arith.mulf %120, %122 : vector<8x256xf32>
    %c7_75 = arith.constant 7 : index
    %c0_76 = arith.constant 0 : index
    %c0_77 = arith.constant 0 : index
    %124 = vector.load %arg10[%c7_75, %c0_76, %c0_77] : memref<9x8x8xf32, #tpu.memory_space<vmem>>, vector<1x8x8xf32>
    %125 = vector.shape_cast %124 : vector<1x8x8xf32> to vector<8x8xf32>
    %cst_78 = arith.constant dense<0.000000e+00> : vector<8x256xf32>
    %126 = tpu.matmul %125, %123, %cst_78 {dimension_numbers = #tpu.dot_dimension_numbers<[1], [0], [0], [1], [0, 0, 1, 1], [], []>} : vector<8x8xf32>, vector<8x256xf32>, vector<8x256xf32> -> vector<8x256xf32>
    %127 = arith.addf %119, %126 : vector<8x256xf32>
    %c239_i32 = arith.constant 239 : i32
    %128 = tpu.dynamic_rotate %68 by %c239_i32 dim 1 : vector<8x256xf32>, i32 -> vector<8x256xf32>
    %c8 = arith.constant 8 : index
    %c0_79 = arith.constant 0 : index
    %129 = vector.load %arg12[%c8, %c0_79] : memref<9x256xf32, #tpu.memory_space<vmem>>, vector<1x256xf32>
    %130 = vector.broadcast %129 : vector<1x256xf32> to vector<8x256xf32>
    %131 = arith.mulf %128, %130 : vector<8x256xf32>
    %c8_80 = arith.constant 8 : index
    %c0_81 = arith.constant 0 : index
    %c0_82 = arith.constant 0 : index
    %132 = vector.load %arg10[%c8_80, %c0_81, %c0_82] : memref<9x8x8xf32, #tpu.memory_space<vmem>>, vector<1x8x8xf32>
    %133 = vector.shape_cast %132 : vector<1x8x8xf32> to vector<8x8xf32>
    %cst_83 = arith.constant dense<0.000000e+00> : vector<8x256xf32>
    %134 = tpu.matmul %133, %131, %cst_83 {dimension_numbers = #tpu.dot_dimension_numbers<[1], [0], [0], [1], [0, 0, 1, 1], [], []>} : vector<8x8xf32>, vector<8x256xf32>, vector<8x256xf32> -> vector<8x256xf32>
    %135 = arith.addf %127, %134 : vector<8x256xf32>
    %c0_84 = arith.constant 0 : index
    %c0_85 = arith.constant 0 : index
    %136 = vector.load %arg11[%c0_84, %c0_85] : memref<8x1xf32, #tpu.memory_space<vmem>>, vector<8x1xf32>
    %137 = vector.broadcast %136 : vector<8x1xf32> to vector<8x256xf32>
    %138 = arith.addf %135, %137 : vector<8x256xf32>
    %cst_86 = arith.constant dense<0.000000e+00> : vector<8xf32>
    %139 = vector.multi_reduction <add>, %138, %cst_86 [1] : vector<8x256xf32> to vector<8xf32>
    %140 = vector.shape_cast %139 : vector<8xf32> to vector<8x1xf32>
    %141 = arith.mulf %138, %138 : vector<8x256xf32>
    %cst_87 = arith.constant dense<0.000000e+00> : vector<8xf32>
    %142 = vector.multi_reduction <add>, %141, %cst_87 [1] : vector<8x256xf32> to vector<8xf32>
    %143 = vector.shape_cast %142 : vector<8xf32> to vector<8x1xf32>
    %c0_88 = arith.constant 0 : index
    %c0_89 = arith.constant 0 : index
    %144 = vector.load %arg7[%c0_88, %c0_89] : memref<8x8xf32, #tpu.memory_space<vmem>>, vector<8x8xf32>
    %cst_90 = arith.constant dense<0.000000e+00> : vector<8x1xf32>
    %145 = tpu.matmul %144, %140, %cst_90 {dimension_numbers = #tpu.dot_dimension_numbers<[1], [0], [0], [1], [0, 0, 1, 1], [], []>} : vector<8x8xf32>, vector<8x1xf32>, vector<8x1xf32> -> vector<8x1xf32>
    %cst_91 = arith.constant 9.765625E-4 : f32
    %146 = vector.broadcast %cst_91 : f32 to vector<8x1xf32>
    %147 = arith.mulf %145, %146 : vector<8x1xf32>
    %c0_92 = arith.constant 0 : index
    %c0_93 = arith.constant 0 : index
    %148 = vector.load %arg7[%c0_92, %c0_93] : memref<8x8xf32, #tpu.memory_space<vmem>>, vector<8x8xf32>
    %cst_94 = arith.constant dense<0.000000e+00> : vector<8x1xf32>
    %149 = tpu.matmul %148, %143, %cst_94 {dimension_numbers = #tpu.dot_dimension_numbers<[1], [0], [0], [1], [0, 0, 1, 1], [], []>} : vector<8x8xf32>, vector<8x1xf32>, vector<8x1xf32> -> vector<8x1xf32>
    %cst_95 = arith.constant 9.765625E-4 : f32
    %150 = vector.broadcast %cst_95 : f32 to vector<8x1xf32>
    %151 = arith.mulf %149, %150 : vector<8x1xf32>
    %152 = arith.mulf %147, %147 : vector<8x1xf32>
    %153 = arith.subf %151, %152 : vector<8x1xf32>
    %cst_96 = arith.constant 0.000000e+00 : f32
    %154 = vector.broadcast %cst_96 : f32 to vector<8x1xf32>
    %155 = arith.maximumf %153, %154 : vector<8x1xf32>
    %c0_97 = arith.constant 0 : index
    %c0_98 = arith.constant 0 : index
    %156 = vector.load %arg13[%c0_97, %c0_98] : memref<8x1xf32, #tpu.memory_space<vmem>>, vector<8x1xf32>
    %cst_99 = arith.constant 9.99999974E-6 : f32
    %157 = vector.broadcast %cst_99 : f32 to vector<8x1xf32>
    %158 = arith.addf %155, %157 : vector<8x1xf32>
    %159 = math.rsqrt %158 : vector<8x1xf32>
    %160 = arith.mulf %156, %159 : vector<8x1xf32>
    %c0_100 = arith.constant 0 : index
    %c0_101 = arith.constant 0 : index
    %161 = vector.load %arg14[%c0_100, %c0_101] : memref<8x1xf32, #tpu.memory_space<vmem>>, vector<8x1xf32>
    %162 = arith.mulf %147, %160 : vector<8x1xf32>
    %163 = arith.subf %161, %162 : vector<8x1xf32>
    %164 = vector.broadcast %160 : vector<8x1xf32> to vector<8x256xf32>
    %165 = arith.mulf %138, %164 : vector<8x256xf32>
    %166 = vector.broadcast %163 : vector<8x1xf32> to vector<8x256xf32>
    %167 = arith.addf %165, %166 : vector<8x256xf32>
    %cst_102 = arith.constant 0.000000e+00 : f32
    %168 = vector.broadcast %cst_102 : f32 to vector<8x256xf32>
    %169 = arith.maximumf %167, %168 : vector<8x256xf32>
    %c0_103 = arith.constant 0 : index
    %c0_104 = arith.constant 0 : index
    %170 = vector.load %arg15[%c0_103, %c0_104] : memref<4x8xf32, #tpu.memory_space<vmem>>, vector<4x8xf32>
    %cst_105 = arith.constant dense<0.000000e+00> : vector<4x256xf32>
    %171 = tpu.matmul %170, %169, %cst_105 {dimension_numbers = #tpu.dot_dimension_numbers<[1], [0], [0], [1], [0, 0, 1, 1], [], []>} : vector<4x8xf32>, vector<8x256xf32>, vector<4x256xf32> -> vector<4x256xf32>
    %c0_106 = arith.constant 0 : index
    %c0_107 = arith.constant 0 : index
    %172 = vector.load %arg16[%c0_106, %c0_107] : memref<4x1xf32, #tpu.memory_space<vmem>>, vector<4x1xf32>
    %173 = vector.broadcast %172 : vector<4x1xf32> to vector<4x256xf32>
    %174 = arith.addf %171, %173 : vector<4x256xf32>
    %c0_108 = arith.constant 0 : index
    %c0_109 = arith.constant 0 : index
    %c0_110 = arith.constant 0 : index
    %175 = vector.load %arg1[%c0_108, %c0_109, %c0_110] : memref<1x4x256xf32, #tpu.memory_space<vmem>>, vector<1x4x256xf32>
    %176 = vector.shape_cast %175 : vector<1x4x256xf32> to vector<4x256xf32>
    %177 = arith.addf %174, %176 : vector<4x256xf32>
    %c0_111 = arith.constant 0 : index
    %c0_112 = arith.constant 0 : index
    %c0_113 = arith.constant 0 : index
    %178 = vector.load %arg17[%c0_111, %c0_112, %c0_113] : memref<1x4x256xf32, #tpu.memory_space<vmem>>, vector<1x4x256xf32>
    %179 = vector.shape_cast %178 : vector<1x4x256xf32> to vector<4x256xf32>
    %180 = vector.shape_cast %177 : vector<4x256xf32> to vector<1x4x256xf32>
    tpu.vector_store %arg17[%c0_111, %c0_112, %c0_113], %180 {strides = array<i32>} : memref<1x4x256xf32, #tpu.memory_space<vmem>>, vector<1x4x256xf32>,
    return
  }
  func.func @transform_0(%arg0: i32) -> (i32, i32, i32) {
    %c0_i32 = arith.constant 0 : i32
    %c0_i32_0 = arith.constant 0 : i32
    %c0_i32_1 = arith.constant 0 : i32
    return %arg0, %c0_i32, %c0_i32_0 : i32, i32, i32
  }
  func.func @transform_1(%arg0: i32) -> (i32, i32) {
    %c0_i32 = arith.constant 0 : i32
    %c0_i32_0 = arith.constant 0 : i32
    %c0_i32_1 = arith.constant 0 : i32
    return %c0_i32, %c0_i32_0 : i32, i32
  }
  func.func @transform_2(%arg0: i32) -> (i32, i32) {
    %c0_i32 = arith.constant 0 : i32
    %c0_i32_0 = arith.constant 0 : i32
    %c0_i32_1 = arith.constant 0 : i32
    return %c0_i32, %c0_i32_0 : i32, i32
  }
  func.func @transform_3(%arg0: i32) -> (i32, i32) {
    %c0_i32 = arith.constant 0 : i32
    %c0_i32_0 = arith.constant 0 : i32
    %c0_i32_1 = arith.constant 0 : i32
    return %c0_i32, %c0_i32_0 : i32, i32
  }
  func.func @transform_4(%arg0: i32) -> (i32, i32) {
    %c0_i32 = arith.constant 0 : i32
    %c0_i32_0 = arith.constant 0 : i32
    %c0_i32_1 = arith.constant 0 : i32
    return %c0_i32, %c0_i32_0 : i32, i32
  }
  func.func @transform_5(%arg0: i32) -> (i32, i32) {
    %c0_i32 = arith.constant 0 : i32
    %c0_i32_0 = arith.constant 0 : i32
    %c0_i32_1 = arith.constant 0 : i32
    return %c0_i32, %c0_i32_0 : i32, i32
  }
  func.func @transform_6(%arg0: i32) -> (i32, i32) {
    %c0_i32 = arith.constant 0 : i32
    %c0_i32_0 = arith.constant 0 : i32
    %c0_i32_1 = arith.constant 0 : i32
    return %c0_i32, %c0_i32_0 : i32, i32
  }
  func.func @transform_7(%arg0: i32) -> (i32, i32) {
    %c0_i32 = arith.constant 0 : i32
    %c0_i32_0 = arith.constant 0 : i32
    %c0_i32_1 = arith.constant 0 : i32
    return %c0_i32, %c0_i32_0 : i32, i32
  }
  func.func @transform_8(%arg0: i32) -> (i32, i32) {
    %c0_i32 = arith.constant 0 : i32
    %c0_i32_0 = arith.constant 0 : i32
    %c0_i32_1 = arith.constant 0 : i32
    return %c0_i32, %c0_i32_0 : i32, i32
  }
  func.func @transform_9(%arg0: i32) -> (i32, i32, i32) {
    %c0_i32 = arith.constant 0 : i32
    %c0_i32_0 = arith.constant 0 : i32
    %c0_i32_1 = arith.constant 0 : i32
    %c0_i32_2 = arith.constant 0 : i32
    return %c0_i32, %c0_i32_0, %c0_i32_1 : i32, i32, i32
  }
  func.func @transform_10(%arg0: i32) -> (i32, i32) {
    %c0_i32 = arith.constant 0 : i32
    %c0_i32_0 = arith.constant 0 : i32
    %c0_i32_1 = arith.constant 0 : i32
    return %c0_i32, %c0_i32_0 : i32, i32
  }
  func.func @transform_11(%arg0: i32) -> (i32, i32) {
    %c0_i32 = arith.constant 0 : i32
    %c0_i32_0 = arith.constant 0 : i32
    %c0_i32_1 = arith.constant 0 : i32
    return %c0_i32, %c0_i32_0 : i32, i32
  }
  func.func @transform_12(%arg0: i32) -> (i32, i32) {
    %c0_i32 = arith.constant 0 : i32
    %c0_i32_0 = arith.constant 0 : i32
    %c0_i32_1 = arith.constant 0 : i32
    return %c0_i32, %c0_i32_0 : i32, i32
  }
  func.func @transform_13(%arg0: i32) -> (i32, i32) {
    %c0_i32 = arith.constant 0 : i32
    %c0_i32_0 = arith.constant 0 : i32
    %c0_i32_1 = arith.constant 0 : i32
    return %c0_i32, %c0_i32_0 : i32, i32
  }
  func.func @transform_14(%arg0: i32) -> (i32, i32) {
    %c0_i32 = arith.constant 0 : i32
    %c0_i32_0 = arith.constant 0 : i32
    %c0_i32_1 = arith.constant 0 : i32
    return %c0_i32, %c0_i32_0 : i32, i32
  }
  func.func @transform_15(%arg0: i32) -> (i32, i32) {
    %c0_i32 = arith.constant 0 : i32
    %c0_i32_0 = arith.constant 0 : i32
    %c0_i32_1 = arith.constant 0 : i32
    return %c0_i32, %c0_i32_0 : i32, i32
  }
  func.func @transform_16(%arg0: i32) -> (i32, i32, i32) {
    %c0_i32 = arith.constant 0 : i32
    %c0_i32_0 = arith.constant 0 : i32
    %c0_i32_1 = arith.constant 0 : i32
    return %arg0, %c0_i32, %c0_i32_0 : i32, i32, i32
  }
}

</mosaic_0001>

<bundles_post_ra>
// kernel: bottleneck_forward.1
= control target key start
LH: loop header
LB: loop body
LE: loop exit
PB: predicated region body
PF: predicated region fallthrough
CT: control target
= control target key end

     0   :  { %s2441_s21 = smov 0   ;;  %s2687_s0 = inlined_call_operand.vmem [shape: f32[2,4,256], index: 0, kind: input, shape index: {}]   ;;  %s2688_s1 = inlined_call_operand.vmem [shape: f32[4,4], index: 1, kind: input, shape index: {}]   ;;  %s2689_s2 = inlined_call_operand.vmem [shape: f32[4,1], index: 2, kind: input, shape index: {}]   ;;  %s2690_s3 = inlined_call_operand.vmem [shape: f32[4,1], index: 3, kind: input, shape index: {}]   ;;  %s2691_s4 = inlined_call_operand.vmem [shape: f32[8,4], index: 4, kind: input, shape index: {}]   ;;  %s2692_s5 = inlined_call_operand.vmem [shape: f32[8,1], index: 5, kind: input, shape index: {}]   ;;  %s2693_s6 = inlined_call_operand.vmem [shape: f32[8,8], index: 6, kind: input, shape index: {}]   ;;  %s2694_s7 = inlined_call_operand.vmem [shape: f32[8,1], index: 7, kind: input, shape index: {}]   ;;  %s2695_s8 = inlined_call_operand.vmem [shape: f32[8,1], index: 8, kind: input, shape index: {}]   ;;  %s2696_s9 = inlined_call_operand.vmem [shape: f32[9,8,8], index: 9, kind: input, shape index: {}]   ;;  %s2697_s10 = inlined_call_operand.vmem [shape: f32[8,1], index: 10, kind: input, shape index: {}]   ;;  %s2698_s11 = inlined_call_operand.vmem [shape: f32[9,256], index: 11, kind: input, shape index: {}]   ;;  %s2699_s12 = inlined_call_operand.vmem [shape: f32[8,1], index: 12, kind: input, shape index: {}]   ;;  %s2700_s13 = inlined_call_operand.vmem [shape: f32[8,1], index: 13, kind: input, shape index: {}]   ;;  %s2701_s14 = inlined_call_operand.vmem [shape: f32[4,8], index: 14, kind: input, shape index: {}]   ;;  %s2702_s15 = inlined_call_operand.vmem [shape: f32[4,1], index: 15, kind: input, shape index: {}]   ;;  %s2703_s16 = inlined_call_operand.vmem [shape: f32[2,4,256], index: 16, kind: output, shape index: {}]  }
   0x1   :  { %2704 = sst [smem:[#allocation2_spill]] %s2687_s0 }
   0x2 LB: > { %s2200_s22 = sadd.s32 4294967295, %s2342_s21   ;;  %p2204_p0 = scmp.ge.s32.totalorder %s2342_s21, 1  ;;  %s2342_s21 = sphi %s2441_s21, %s26_s21  }
   0x3   : > { %p462_p1 = scmp.lt.s32.totalorder %s2342_s21, 3 }
   0x5   : > { %p463_p2 = pnand %p2204_p0, %p462_p1 }
   0x6   : > { %p512_p3 = scmp.lt.s32.totalorder (!%p463_p2), %s2200_s22, 1  ;;  %v2344_v0 = vmov (!%p463_p2), 0.0   ;;  %vm526_vm0 = vcmask (!%p463_p2), 1043456   ;;  %s2705_s26 = sld [smem:[#allocation2_spill]] (!%p463_p2)  ;;  %vm2345_vm1 = vmmov (!%p463_p2), 0   ;;  %vm542_vm2 = vcmask (!%p463_p2), 31744  }
   0x7   : > { %466 = sbr.rel (%p463_p2) target bundleno = 2421 (0x975), region = 84  ;;  %2261 = vmatprep.subr.mxu0 (!%p463_p2), %v2344_v0  ;;  %1114 = vmatprep.mubr.f32.mxu1 (!%p463_p2), %v2344_v0  ;;  %v541_v11 = vld [vmem:[%s2688_s1] sm:$0xf] (!%p463_p2)  ;;  %v2346_v14 = vmov (!%p463_p2), 0   ;;  %v2347_v32 = vmov (!%p463_p2), 839922192   ;;  %v711_v34 = vlaneseq (!%p463_p2) }
   0x8   : > { %2263 = vmatprep.mubr.msk.f32.mxu0 (!%p463_p2), %vm2345_vm1, %v2344_v0  ;;  %2327 = vset.pattern.permute.xlu1 (!%p463_p2), %v2346_v14  ;;  %v697_v25 = vld [vmem:[%s2689_s2] sm:$0xf] (!%p463_p2)  ;;  %v709_v33 = vunpack.c.l.s4 (!%p463_p2), %v2347_v32  ;;  %vm827_vm3 = vcmask (!%p463_p2), 64512   ;;  %s2348_s17 = smov (!%p463_p2), 17   ;;  %s2349_s18 = smov (!%p463_p2), 16  }
   0x9   : > { %2328 = vset.pattern.permute.xlu0 (!%p463_p2), %v2346_v14  ;;  %v701_v28 = vld [vmem:[%s2690_s3] sm:$0xf] (!%p463_p2)  ;;  %v2496_v36 = vshrl.u32 (!%p463_p2), %v711_v34, 7  ;;  %s2350_s19 = smov (!%p463_p2), 15   ;;  %s2351_s20 = smov (!%p463_p2), 1  }
   0xa   : > { %v732_v31 = vld [vmem:[%s2692_s5] sm:$0xff] (!%p463_p2)  ;;  %v710_v35 = vunpack.c.0.s8 (!%p463_p2), %v709_v33  ;;  %s2352_s24 = smov (!%p463_p2), 127   ;;  %s2353_s25 = smov (!%p463_p2), 113  }
   0xb   : > { %v731_v46 = vld [vmem:[%s2691_s4] sm:$0xff] (!%p463_p2) }
   0xc   : > { %v713_v37 = vsub.s32 (!%p463_p2), %v710_v35, %v2496_v36  ;;  %v2512_v56 = vld [vmem:[%s2693_s6] sm:$0xff] (!%p463_p2) }
   0xe   : > { %s2707_s22 = smov (!%p512_p3, %s2200_s22), 1 }
   0xf   : > { %s2247_s23 = sshll.u32 %s2707_s22, 3 }
  0x10   : > { %s516_s27 = scalar_lea.vmem %s2705_s26, %s2247_s23  ;;  %s2354_s26 = smov 112  }
  0x11   : > { %v2459_v1 = vld [vmem:[%s516_s27] sm:$0xff]  ;;  %s2355_s27 = smov 111  }
  0x12   : > { %v2463_v2 = vcombine.high %v2459_v1, %v2459_v1  ;;  %v527_v3 = vsel %vm526_vm0, %v2459_v1, 0.0  ;;  %v532_v4 = vmul.f32 %v2459_v1, %v2459_v1 }
  0x14   : > { %v528_v5 = vsel %vm526_vm0, %v2463_v2, 0.0  ;;  %v534_v6 = vcombine.high %v532_v4, %v532_v4  ;;  %v536_v7 = vsel %vm526_vm0, %v532_v4, 0.0 }
  0x15   : > { %v529_v8 = vadd.f32 %v528_v5, %v527_v3 }
  0x16   : > { %v537_v9 = vsel %vm526_vm0, %v534_v6, 0.0 }
  0x17   : > { %530 = vadd.xlane.f32.xlu0 %v529_v8  ;;  %v538_v10 = vadd.f32 %v537_v9, %v536_v7  ;;  %v976_v8 = vld [vmem:[%s2694_s7] sm:$0xff] }
  0x1b   : > { %539 = vadd.xlane.f32.xlu0 %v538_v10 }
  0x31   : > { %735 = vperm.xlu0 %2328, %v732_v31   ;;  %v1008_v31 = vld [vmem:[%s2698_s11] ss:$8 sm:$0x3] }
  0xa4   : > { %v531_v12 = vpop.xlane.xlu0 %530 }
  0xa5   : > { %2262 = vmatpush3.msk.msra.mxu0 %vm526_vm0, %v531_v12 }
  0xa6   : > { %2264 = vmatmul.mubr.msk.f32.vlgmr.msra.gmra.mrb[0].mxu0 %vm542_vm2, %v541_v11  ;;  %2266 = vmatprep.subr.mxu0 %v2344_v0 }
  0xa7   : > { %2268 = vmatprep.mubr.msk.f32.mxu0 %vm2345_vm1, %v2344_v0 }
  0xa8   : > { %v540_v13 = vpop.xlane.xlu0 %539 }
  0xa9   : > { %2267 = vmatpush3.msk.msra.mxu0 %vm526_vm0, %v540_v13 }
  0xaa   : > { %2269 = vmatmul.mubr.msk.f32.vlgmr.msra.gmra.mrb[2].mxu0 %vm542_vm2, %v541_v11  ;;  %v980_v11 = vld [vmem:[%s2695_s8] sm:$0xff] }
  0xab   : > { %811 = vmatprep.mubr.f32.mxu0 %v2344_v0 }
  0xb0   : > { %v736_v47 = vpop.permute.xlu0 %735 }
 0x179   : > { %v615_v15 = vpop.f32.mrb[0].mxu0 }
 0x17a   : > { %v619_v16 = vmul.f32 0.001953125, %v615_v15  ;;  %v2265_v17 = vpop.f32.mrb[1].mxu0 }
 0x17c   : > { %v694_v19 = vmul.f32 %v619_v16, %v619_v16 }
 0x17d   : > { %v689_v18 = vpop.f32.mrb[2].mxu0 }
 0x17e   : > { %v693_v20 = vmul.f32 0.001953125, %v689_v18  ;;  %v2270_v21 = vpop.f32.mrb[3].mxu0 }
 0x180   : > { %v695_v22 = vsub.f32 %v693_v20, %v694_v19 }
 0x182   : > { %v696_v23 = vmax.f32 %v695_v22, 0.0  ;;  %v1873_v22 = vld [vmem:[%s2697_s10] sm:$0xff] }
 0x184   : > { %v698_v24 = vadd.f32 1e-05, %v696_v23  ;;  %v2554_v23 = vand.u32 127, %v711_v34 }
 0x186   : > { %2330 = vrsqrt.f32 %v698_v24  ;;  %v2557_v24 = vsub.s32 0, %v2496_v36  ;;  %vm1027_vm4 = vcmp.lt.s32.totalorder %v2554_v23, 16  ;;  %vm1005_vm5 = vcmp.lt.s32.totalorder %v2554_v23, 17 }
 0x187   : > { %vm1199_vm6 = vcmp.lt.s32.totalorder %v2554_v23, 15  ;;  %vm1299_vm7 = vcmp.lt.s32.totalorder %v2554_v23, 1  ;;  %vm1477_vm8 = vcmp.lt.s32.totalorder %v2554_v23, 127  ;;  %vm1577_vm9 = vcmp.lt.s32.totalorder %v2554_v23, 113 }
 0x188   : > { %vm1677_vm10 = vcmp.lt.s32.totalorder %v2554_v23, 112  ;;  %vm1777_vm11 = vcmp.lt.s32.totalorder %v2554_v23, 111  ;;  %v2228_v23 = vld [vmem:[%s2696_s9 + $0x20] sm:$0xff] }
 0x190   : > { %v2331_v26 = vpop.eup %2330 }
 0x191   : > { %v700_v27 = vmul.f32 %v2331_v26, %v697_v25  ;;  %v2560_v25 = vsub.s32 1, %v2496_v36  ;;  %v2218_v26 = vld [vmem:[%s2698_s11 + $0x1] ss:$8 sm:$0x3] }
 0x193   : > { %706 = vperm.xlu1 %2327, %v700_v27   ;;  %v702_v29 = vmul.f32 %v700_v27, %v619_v16 }
 0x195   : > { %v703_v30 = vsub.f32 %v701_v28, %v702_v29  ;;  %v1040_v29 = vrot.slane %v2218_v26, %v2560_v25 }
 0x197   : > { %719 = vperm.xlu1 %2327, %v703_v30   ;;  %v1036_v30 = vrot.slane %v2218_v26, %v2557_v24 }
 0x212   : > { %v707_v38 = vpop.permute.xlu1 %706 }
 0x213   : > { %v714_v39 = vrot.slane %v707_v38, %v713_v37  ;;  %v1017_v38 = vrot.slane %v1008_v31, %v2560_v25 }
 0x215   : > { %v716_v41 = vmul.f32 %v714_v39, %v2459_v1 }
 0x216   : > { %v720_v40 = vpop.permute.xlu1 %719 }
 0x217   : > { %v727_v42 = vrot.slane %v720_v40, %v713_v37  ;;  %v1013_v37 = vrot.slane %v1008_v31, %v2557_v24  ;;  %v2219_v40 = vld [vmem:[%s2696_s9 + $0x8] sm:$0xff] }
 0x219   : > { %v729_v43 = vadd.f32 %v727_v42, %v716_v41  ;;  %v2222_v41 = vld [vmem:[%s2698_s11 + $0x2] ss:$8 sm:$0x3] }
 0x21b   : > { %v730_v44 = vmax.f32 %v729_v43, 0.0 }
 0x21d   : > { %v739_v45 = vcombine.high %v730_v44, %v730_v44 }
 0x21f   : > { %2213 = vmatprep.subr.msk.mxu0 %vm526_vm0, %v739_v45 }
 0x220   : > { %2214 = vmatpush1.msk.msra.mxu0 %vm526_vm0, %v730_v44 }
 0x221   : > { %2215 = vmatmul.mubr.msk.f32.vlgmr.msra.gmra.mrb[4].mxu0 %vm542_vm2, %v731_v46  ;;  %2271 = vmatprep.subr.mxu0 %v2344_v0 }
 0x222   : > { %2273 = vmatprep.mubr.msk.f32.mxu0 %vm2345_vm1, %v2344_v0 }
 0x2f4   : > { %v813_v48 = vpop.f32.mrb[4].mxu0 }
 0x2f5   : > { %v814_v49 = vadd.f32 %v813_v48, %v736_v47  ;;  %v815_v50 = vpop.f32.mrb[5].mxu0  ;;  %v1208_v48 = vrot.slane %v2222_v41, %v2557_v24 }
 0x2f6   : > { %v816_v51 = vadd.f32 %v815_v50, %v736_v47  ;;  %v2225_v50 = vld [vmem:[%s2698_s11 + $0x3] ss:$8 sm:$0x3] }
 0x2f7   : > { %v821_v53 = vmul.f32 %v814_v49, %v814_v49 }
 0x2f8   : > { %v818_v52 = vadd.f32 %v816_v51, %v814_v49  ;;  %v822_v54 = vmul.f32 %v816_v51, %v816_v51 }
 0x2fa   : > { %819 = vadd.xlane.f32.xlu1 %v818_v52  ;;  %v823_v55 = vadd.f32 %v822_v54, %v821_v53 }
 0x2fe   : > { %824 = vadd.xlane.f32.xlu1 %v823_v55 }
 0x387   : > { %v820_v57 = vpop.xlane.xlu1 %819 }
 0x388   : > { %2272 = vmatpush3.msra.mxu0 %v820_v57 }
 0x389   : > { %2274 = vmatmul.mubr.msk.f32.vlgmr.msra.gmra.mrb[6].mxu0 %vm827_vm3, %v2512_v56  ;;  %2276 = vmatprep.subr.mxu0 %v2344_v0 }
 0x38a   : > { %2278 = vmatprep.mubr.msk.f32.mxu0 %vm2345_vm1, %v2344_v0 }
 0x38b   : > { %v825_v58 = vpop.xlane.xlu1 %824 }
 0x38c   : > { %2277 = vmatpush3.msra.mxu0 %v825_v58  ;;  %v1308_v58 = vrot.slane %v2225_v50, %v2557_v24 }
 0x38d   : > { %2279 = vmatmul.mubr.msk.f32.vlgmr.msra.gmra.mrb[8].mxu0 %vm827_vm3, %v2512_v56  ;;  %2281 = vmatprep.subr.mxu0 %v2344_v0 }
 0x38e   : > { %2283 = vmatprep.mubr.msk.f32.mxu0 %vm2345_vm1, %v2344_v0 }
 0x45c   : > { %v897_v59 = vpop.f32.mrb[6].mxu0 }
 0x45d   : > { %v901_v60 = vmul.f32 0.0009765625, %v897_v59  ;;  %v2275_v61 = vpop.f32.mrb[7].mxu0  ;;  %v1312_v59 = vrot.slane %v2225_v50, %v2560_v25 }
 0x45e   : > { %v2230_v61 = vld [vmem:[%s2698_s11 + $0x5] ss:$8 sm:$0x3] }
 0x45f   : > { %v973_v63 = vmul.f32 %v901_v60, %v901_v60 }
 0x460   : > { %v968_v62 = vpop.f32.mrb[8].mxu0 }
 0x461   : > { %v972_v3 = vmul.f32 0.0009765625, %v968_v62  ;;  %v2280_v4 = vpop.f32.mrb[9].mxu0 }
 0x463   : > { %v974_v5 = vsub.f32 %v972_v3, %v973_v63 }
 0x465   : > { %v975_v6 = vmax.f32 %v974_v5, 0.0 }
 0x467   : > { %v977_v7 = vadd.f32 1e-05, %v975_v6  ;;  %v1486_v6 = vrot.slane %v2230_v61, %v2557_v24 }
 0x469   : > { %2332 = vrsqrt.f32 %v977_v7  ;;  %v1490_v7 = vrot.slane %v2230_v61, %v2560_v25 }
 0x473   : > { %v2333_v9 = vpop.eup %2332 }
 0x474   : > { %v979_v10 = vmul.f32 %v2333_v9, %v976_v8  ;;  %v2233_v8 = vld [vmem:[%s2698_s11 + $0x6] ss:$8 sm:$0x3] }
 0x476   : > { %985 = vperm.xlu1 %2327, %v979_v10   ;;  %v981_v12 = vmul.f32 %v979_v10, %v901_v60  ;;  %v1022_v60 = vld [vmem:[%s2696_s9] sm:$0xff] }
 0x478   : > { %v982_v13 = vsub.f32 %v980_v11, %v981_v12 }
 0x47a   : > { %992 = vperm.xlu0 %2328, %v982_v13  }
 0x4f5   : > { %v986_v14 = vpop.permute.xlu1 %985 }
 0x4f6   : > { %v988_v15 = vmul.f32 %v986_v14, %v814_v49  ;;  %v989_v16 = vmul.f32 %v986_v14, %v816_v51  ;;  %v1212_v49 = vrot.slane %v2222_v41, %v2560_v25 }
 0x4f9   : > { %v993_v17 = vpop.permute.xlu0 %992 }
 0x4fa   : > { %v995_v18 = vadd.f32 %v993_v17, %v988_v15  ;;  %v996_v19 = vadd.f32 %v993_v17, %v989_v16  ;;  %v1586_v15 = vrot.slane %v2233_v8, %v2557_v24  ;;  %v1590_v16 = vrot.slane %v2233_v8, %v2560_v25  ;;  %v2223_v17 = vld [vmem:[%s2696_s9 + $0x10] sm:$0xff]  ;;  %v2034_v8 = vld [vmem:[%s2699_s12] sm:$0xff] }
 0x4fc   : > { %v2530_v20 = vmax.f32 %v995_v18, 0.0  ;;  %v2532_v21 = vmax.f32 %v996_v19, 0.0  ;;  %v2236_v18 = vld [vmem:[%s2698_s11 + $0x7] ss:$8 sm:$0x3] }
 0x4fd   : > { %v1690_v31 = vrot.slane %v2236_v18, %v2560_v25 }
 0x4fe   : > { %1001 = vrot.lane.b32.xlu1 %v2532_v21, %s2348_s17  ;;  %1023 = vrot.lane.b32.xlu0 %v2530_v20, %s2349_s18 }
 0x502   : > { %1197 = vrot.lane.b32.xlu1 %v2532_v21, %s2350_s19  ;;  %1025 = vrot.lane.b32.xlu0 %v2532_v21, %s2349_s18 }
 0x506   : > { %1297 = vrot.lane.b32.xlu1 %v2532_v21, %s2351_s20  ;;  %999 = vrot.lane.b32.xlu0 %v2530_v20, %s2348_s17 }
 0x50a   : > { %1475 = vrot.lane.b32.xlu1 %v2532_v21, %s2352_s24  ;;  %1195 = vrot.lane.b32.xlu0 %v2530_v20, %s2350_s19 }
 0x50e   : > { %1575 = vrot.lane.b32.xlu1 %v2532_v21, %s2353_s25  ;;  %1295 = vrot.lane.b32.xlu0 %v2530_v20, %s2351_s20 }
 0x512   : > { %1675 = vrot.lane.b32.xlu1 %v2532_v21, %s2354_s26  ;;  %1473 = vrot.lane.b32.xlu0 %v2530_v20, %s2352_s24 }
 0x516   : > { %1775 = vrot.lane.b32.xlu1 %v2532_v21, %s2355_s27  ;;  %1573 = vrot.lane.b32.xlu0 %v2530_v20, %s2353_s25 }
 0x51a   : > { %1673 = vrot.lane.b32.xlu0 %v2530_v20, %s2354_s26  ;;  %s521_s26 = scalar_lea.vmem %s2703_s16, %s2247_s23 }
 0x51e   : > { %1773 = vrot.lane.b32.xlu0 %v2530_v20, %s2355_s27 }
 0x522   : > { %1876 = vperm.xlu0 %2328, %v1873_v22  }
 0x570   : > { %v1002_v27 = vpop.permute.xlu1 %1001  ;;  %v1024_v28 = vpop.permute.xlu0 %1023 }
 0x574   : > { %v1198_v32 = vpop.permute.xlu1 %1197  ;;  %v1026_v33 = vpop.permute.xlu0 %1025 }
 0x575   : > { %v1029_v34 = vsel %vm1027_vm4, %v1026_v33, %v1024_v28  ;;  %v1028_v35 = vsel %vm1027_vm4, %v1024_v28, %v1026_v33 }
 0x576   : > { %v1044_v36 = vmul.f32 %v1040_v29, %v1028_v35  ;;  %v1043_v39 = vmul.f32 %v1036_v30, %v1029_v34  ;;  %v1686_v30 = vrot.slane %v2236_v18, %v2557_v24 }
 0x578   : > { %v1298_v42 = vpop.permute.xlu1 %1297  ;;  %1050 = vmatprep.subr.mxu1 %v1044_v36  ;;  %v1000_v43 = vpop.permute.xlu0 %999 }
 0x579   : > { %v1006_v44 = vsel %vm1005_vm5, %v1000_v43, %v1002_v27  ;;  %v1007_v45 = vsel %vm1005_vm5, %v1002_v27, %v1000_v43  ;;  %1051 = vmatpush1.msra.mxu1 %v1043_v39 }
 0x57a   : > { %v1020_v46 = vmul.f32 %v1013_v37, %v1007_v45  ;;  %v1021_v47 = vmul.f32 %v1017_v38, %v1006_v44  ;;  %2220 = vmatmul.mubr.msk.f32.vlgmr.msra.gmra.mrb[0].mxu1 %vm827_vm3, %v2219_v40  ;;  %v2226_v40 = vld [vmem:[%s2696_s9 + $0x18] sm:$0xff] }
 0x57b   : > { %1188 = vmatprep.mubr.f32.mxu1 %v2344_v0 }
 0x57c   : > { %1124 = vmatprep.subr.mxu1 %v1021_v47  ;;  %v1196_v51 = vpop.permute.xlu0 %1195  ;;  %v1476_v54 = vpop.permute.xlu1 %1475 }
 0x57d   : > { %v1200_v52 = vsel %vm1199_vm6, %v1196_v51, %v1198_v32  ;;  %v1201_v53 = vsel %vm1199_vm6, %v1198_v32, %v1196_v51  ;;  %1125 = vmatpush1.msra.mxu1 %v1020_v46  ;;  %v2239_v32 = vld [vmem:[%s2698_s11 + $0x10] ss:$8 sm:$0x3]  ;;  %v2240_v46 = vld [vmem:[%s2696_s9 + $0x40] sm:$0xff] }
 0x57e   : > { %v1215_v55 = vmul.f32 %v1208_v48, %v1201_v53  ;;  %v1216_v57 = vmul.f32 %v1212_v49, %v1200_v52  ;;  %v1786_v38 = vrot.slane %v2239_v32, %v2557_v24  ;;  %v1790_v39 = vrot.slane %v2239_v32, %v2560_v25  ;;  %v2231_v24 = vld [vmem:[%s2696_s9 + $0x28] sm:$0xff]  ;;  %v2237_v25 = vld [vmem:[%s2696_s9 + $0x38] sm:$0xff] }
 0x580   : > { %1222 = vmatprep.subr.mxu1 %v1216_v57  ;;  %v1296_v62 = vpop.permute.xlu0 %1295  ;;  %v1576_v9 = vpop.permute.xlu1 %1575 }
 0x581   : > { %v1300_v63 = vsel %vm1299_vm7, %v1296_v62, %v1298_v42  ;;  %v1301_v3 = vsel %vm1299_vm7, %v1298_v42, %v1296_v62 }
 0x582   : > { %v1315_v4 = vmul.f32 %v1308_v58, %v1301_v3  ;;  %v1316_v5 = vmul.f32 %v1312_v59, %v1300_v63  ;;  %2221 = vmatmul.mubr.msk.f32.vlgmr.msra.gmra.mrb[0].mxu1 %vm827_vm3, %v1022_v60 }
 0x583   : > { %1223 = vmatpush1.msra.mxu1 %v1215_v55  ;;  %1286 = vmatprep.mubr.f32.mxu1 %v2344_v0 }
 0x584   : > { %1322 = vmatprep.subr.mxu1 %v1316_v5  ;;  %v1474_v10 = vpop.permute.xlu0 %1473  ;;  %v1676_v27 = vpop.permute.xlu1 %1675 }
 0x585   : > { %v1478_v11 = vsel %vm1477_vm8, %v1474_v10, %v1476_v54  ;;  %v1479_v12 = vsel %vm1477_vm8, %v1476_v54, %v1474_v10 }
 0x586   : > { %v1493_v13 = vmul.f32 %v1486_v6, %v1478_v11  ;;  %v1494_v14 = vmul.f32 %v1490_v7, %v1479_v12  ;;  %v2058_v12 = vld [vmem:[%s2702_s15] sm:$0xf] }
 0x588   : > { %v1574_v19 = vpop.permute.xlu0 %1573  ;;  %v1776_v41 = vpop.permute.xlu1 %1775 }
 0x589   : > { %v1578_v22 = vsel %vm1577_vm9, %v1574_v19, %v1576_v9  ;;  %v1579_v26 = vsel %vm1577_vm9, %v1576_v9, %v1574_v19 }
 0x58a   : > { %v1593_v28 = vmul.f32 %v1586_v15, %v1578_v22  ;;  %v1594_v29 = vmul.f32 %v1590_v16, %v1579_v26  ;;  %2224 = vmatmul.mubr.msk.f32.vlgmr.msra.gmra.mrb[0].mxu1 %vm827_vm3, %v2223_v17  ;;  %v2057_v26 = vld [vmem:[%s2701_s14] sm:$0xf] }
 0x58b   : > { %1323 = vmatpush1.msra.mxu1 %v1315_v4  ;;  %1386 = vmatprep.mubr.f32.mxu1 %v2344_v0 }
 0x58c   : > { %1400 = vmatprep.subr.mxu1 %v2532_v21  ;;  %v1674_v33 = vpop.permute.xlu0 %1673 }
 0x58d   : > { %v1678_v34 = vsel %vm1677_vm10, %v1674_v33, %v1676_v27  ;;  %v1679_v35 = vsel %vm1677_vm10, %v1676_v27, %v1674_v33 }
 0x58e   : > { %v1693_v36 = vmul.f32 %v1686_v30, %v1678_v34  ;;  %v1694_v37 = vmul.f32 %v1690_v31, %v1679_v35 }
 0x590   : > { %v1774_v42 = vpop.permute.xlu0 %1773 }
 0x591   : > { %v1778_v43 = vsel %vm1777_vm11, %v1774_v42, %v1776_v41  ;;  %v1779_v44 = vsel %vm1777_vm11, %v1776_v41, %v1774_v42 }
 0x592   : > { %v1793_v21 = vmul.f32 %v1786_v38, %v1778_v43  ;;  %v1794_v45 = vmul.f32 %v1790_v39, %v1779_v44  ;;  %2227 = vmatmul.mubr.msk.f32.vlgmr.msra.gmra.mrb[0].mxu1 %vm827_vm3, %v2226_v40 }
 0x593   : > { %1401 = vmatpush1.msra.mxu1 %v2530_v20  ;;  %1464 = vmatprep.mubr.f32.mxu1 %v2344_v0  ;;  %v2234_v20 = vld [vmem:[%s2696_s9 + $0x30] sm:$0xff] }
 0x594   : > { %1500 = vmatprep.subr.mxu1 %v1494_v14 }
 0x59a   : > { %2229 = vmatmul.mubr.msk.f32.vlgmr.msra.gmra.mrb[0].mxu1 %vm827_vm3, %v2228_v23 }
 0x59b   : > { %1501 = vmatpush1.msra.mxu1 %v1493_v13  ;;  %1564 = vmatprep.mubr.f32.mxu1 %v2344_v0 }
 0x59c   : > { %1600 = vmatprep.subr.mxu1 %v1594_v29 }
 0x5a1   : > { %v1877_v47 = vpop.permute.xlu0 %1876 }
 0x5a2   : > { %2232 = vmatmul.mubr.msk.f32.vlgmr.msra.gmra.mrb[0].mxu1 %vm827_vm3, %v2231_v24 }
 0x5a3   : > { %1601 = vmatpush1.msra.mxu1 %v1593_v28  ;;  %1664 = vmatprep.mubr.f32.mxu1 %v2344_v0 }
 0x5a4   : > { %1700 = vmatprep.subr.mxu1 %v1694_v37 }
 0x5aa   : > { %2235 = vmatmul.mubr.msk.f32.vlgmr.msra.gmra.mrb[0].mxu1 %vm827_vm3, %v2234_v20 }
 0x5ab   : > { %1701 = vmatpush1.msra.mxu1 %v1693_v36  ;;  %1764 = vmatprep.mubr.f32.mxu1 %v2344_v0 }
 0x5ac   : > { %1800 = vmatprep.subr.mxu1 %v1794_v45 }
 0x5b2   : > { %2238 = vmatmul.mubr.msk.f32.vlgmr.msra.gmra.mrb[0].mxu1 %vm827_vm3, %v2237_v25 }
 0x5b3   : > { %1801 = vmatpush1.msra.mxu1 %v1793_v21  ;;  %1864 = vmatprep.mubr.f32.mxu1 %v2344_v0 }
 0x5ba   : > { %2241 = vmatmul.mubr.msk.f32.vlgmr.msra.gmra.mrb[0].mxu1 %vm827_vm3, %v2240_v46 }
 0x68d   : > { %v1866_v48 = vpop.f32.mrb[0].mxu1 }
 0x68e   : > { %v1879_v49 = vadd.f32 %v1877_v47, %v1866_v48  ;;  %v1868_v50 = vpop.f32.mrb[1].mxu1 }
 0x68f   : > { %v1880_v51 = vadd.f32 %v1877_v47, %v1868_v50 }
 0x690   : > { %v1884_v52 = vmul.f32 %v1879_v49, %v1879_v49 }
 0x691   : > { %v1881_v53 = vadd.f32 %v1880_v51, %v1879_v49  ;;  %v1885_v54 = vmul.f32 %v1880_v51, %v1880_v51 }
 0x693   : > { %1882 = vadd.xlane.f32.xlu1 %v1881_v53  ;;  %v1886_v55 = vadd.f32 %v1885_v54, %v1884_v52 }
 0x695   : > { %1887 = vadd.xlane.f32.xlu0 %v1886_v55 }
 0x720   : > { %v1883_v57 = vpop.xlane.xlu1 %1882 }
 0x721   : > { %2282 = vmatpush3.msra.mxu0 %v1883_v57 }
 0x722   : > { %v1888_v58 = vpop.xlane.xlu0 %1887  ;;  %2284 = vmatmul.mubr.msk.f32.vlgmr.msra.gmra.mrb[10].mxu0 %vm827_vm3, %v2512_v56  ;;  %2286 = vmatprep.subr.mxu0 %v2344_v0 }
 0x723   : > { %2287 = vmatpush3.msra.mxu0 %v1888_v58  ;;  %2288 = vmatprep.mubr.msk.f32.mxu0 %vm2345_vm1, %v2344_v0 }
 0x726   : > { %2289 = vmatmul.mubr.msk.f32.vlgmr.msra.gmra.mrb[12].mxu0 %vm827_vm3, %v2512_v56 }
 0x727   : > { %2131 = vmatprep.mubr.f32.mxu0 %v2344_v0  ;;  %v2038_v0 = vld [vmem:[%s2700_s13] sm:$0xff] }
 0x7f5   : > { %v1955_v59 = vpop.f32.mrb[10].mxu0 }
 0x7f6   : > { %v1959_v60 = vmul.f32 0.0009765625, %v1955_v59  ;;  %v2285_v61 = vpop.f32.mrb[11].mxu0 }
 0x7f8   : > { %v2031_v63 = vmul.f32 %v1959_v60, %v1959_v60 }
 0x7f9   : > { %v2026_v62 = vpop.f32.mrb[12].mxu0 }
 0x7fa   : > { %v2030_v3 = vmul.f32 0.0009765625, %v2026_v62  ;;  %v2290_v4 = vpop.f32.mrb[13].mxu0 }
 0x7fc   : > { %v2032_v5 = vsub.f32 %v2030_v3, %v2031_v63 }
 0x7fe   : > { %v2033_v6 = vmax.f32 %v2032_v5, 0.0 }
 0x800   : > { %v2035_v7 = vadd.f32 1e-05, %v2033_v6 }
 0x802   : > { %2334 = vrsqrt.f32 %v2035_v7 }
 0x80c   : > { %v2335_v9 = vpop.eup %2334 }
 0x80d   : > { %v2037_v10 = vmul.f32 %v2335_v9, %v2034_v8 }
 0x80f   : > { %2043 = vperm.xlu0 %2328, %v2037_v10   ;;  %v2039_v56 = vmul.f32 %v2037_v10, %v1959_v60 }
 0x811   : > { %v2040_v11 = vsub.f32 %v2038_v0, %v2039_v56 }
 0x813   : > { %2050 = vperm.xlu1 %2327, %v2040_v11  }
 0x817   : > { %2061 = vperm.xlu1 %2327, %v2058_v12  }
 0x88e   : > { %v2044_v13 = vpop.permute.xlu0 %2043 }
 0x88f   : > { %v2046_v14 = vmul.f32 %v2044_v13, %v1879_v49  ;;  %v2047_v15 = vmul.f32 %v2044_v13, %v1880_v51 }
 0x892   : > { %v2051_v16 = vpop.permute.xlu1 %2050 }
 0x893   : > { %v2053_v17 = vadd.f32 %v2051_v16, %v2046_v14  ;;  %v2054_v18 = vadd.f32 %v2051_v16, %v2047_v15 }
 0x895   : > { %v2055_v19 = vmax.f32 %v2053_v17, 0.0  ;;  %v2056_v22 = vmax.f32 %v2054_v18, 0.0 }
 0x896   : > { %v2062_v27 = vpop.permute.xlu1 %2061 }
 0x897   : > { %2067 = vmatprep.subr.mxu0 %v2056_v22 }
 0x898   : > { %2068 = vmatpush1.msra.mxu0 %v2055_v19 }
 0x899   : > { %2244 = vmatmul.mubr.msk.f32.vlgmr.msra.gmra.mrb[14].mxu0 %vm827_vm3, %v2057_v26 }
 0x96c   : > { %v2133_v28 = vpop.f32.mrb[14].mxu0 }
 0x96d   : > { %v2134_v29 = vadd.f32 %v2133_v28, %v2062_v27  ;;  %v2135_v30 = vpop.f32.mrb[15].mxu0 }
 0x96e   : > { %v2136_v31 = vadd.f32 %v2135_v30, %v2062_v27 }
 0x96f   : > { %v2138_v32 = vadd.f32 %v2134_v29, %v2459_v1 }
 0x970   : > { %v2139_v33 = vadd.f32 %v2136_v31, %v2463_v2 }
 0x972   : > { %v2142_v34 = vcombine.low %v2138_v32, %v2139_v33 }
 0x974   : > { %2144 = vst [vmem:[%s521_s26] sm:$0xff] %v2142_v34 }
 0x975 PF: > { %s26_s21 = sadd.s32 1, %s2342_s21  }
 0x976   : > { %p23_p4 = scmp.ge.s32.totalorder %s26_s21, 4  }
 0x978   :  { %25 = sbr.rel (!%p23_p4) target bundleno = 2 (0x2), region = 129 }

</bundles_post_ra>
